<compile_context>
chip_gen: v5e
topology: v5e:2x2
jax: 0.10.0
libtpu: 0.0.40
codegen_flags: <defaults>
</compile_context>

<pallas_src>
import functools

import jax
import jax.numpy as jnp
from jax.experimental import pallas as pl
from jax.experimental.pallas import tpu as pltpu


# ---------------------------------------------------------------------------
# Kernel
# ---------------------------------------------------------------------------
def _loss_kernel(x_ref, t_ref, ce_ref, inter_ref, card_ref, *,
                 hw: int, num_classes: int, tile: int, tiles_per_split: int,
                 ragged: bool):
    """Fused softmax / CE / dice-statistics reduction for one (C, TP) tile.

    x_ref:     (C, TP)  logits tile (any float dtype, upcast to f32)
    t_ref:     (1, TP)  int32 labels tile
    ce_ref:    (1, 1)   accumulated sum of per-pixel CE        (per (image, split))
    inter_ref: (C, 1)   accumulated per-class intersection     (per (image, split))
    card_ref:  (C, 1)   accumulated per-class cardinality      (per (image, split))
    """
    i = pl.program_id(2)

    @pl.when(i == 0)
    def _():
        ce_ref[...] = jnp.zeros_like(ce_ref)
        inter_ref[...] = jnp.zeros_like(inter_ref)
        card_ref[...] = jnp.zeros_like(card_ref)

    x = x_ref[...].astype(jnp.float32)          # (C, TP)
    t = t_ref[...]                              # (1, TP) int32
    c, tp = x.shape

    if ragged:
        # Only compiled when some columns of some tiles lie beyond H*W: sanitize
        # the out-of-bounds tail so garbage HBM/VMEM bytes cannot poison the sums.
        j = pl.program_id(1) * tiles_per_split + i
        col = jax.lax.broadcasted_iota(jnp.int32, (1, tp), 1) + j * tile
        valid = col < hw                                      # (1, TP) bool
        x = jnp.where(valid, x, 0.0)
        # Sentinel class == C never matches the class iota, so pad columns drop
        # out of the intersection / label-count / CE terms for free.
        t = jnp.where(valid, t, num_classes)

    # Numerically-stable softmax over the class (sublane) axis.
    m = jnp.max(x, axis=0, keepdims=True)                     # (1, TP)
    xm = x - m                                                # (C, TP)
    ex = jnp.exp(xm)                                          # (C, TP) EUP
    denom = jnp.sum(ex, axis=0, keepdims=True)                # (1, TP)
    # Approx EUP reciprocal feeds only the dice statistics (tolerant); the CE
    # path below uses the exact log(denom).
    probs = ex * pl.reciprocal(denom, approx=True)            # (C, TP)

    # Bool class mask (one-hot is never materialized as f32).
    cls = jax.lax.broadcasted_iota(jnp.int32, (c, tp), 0)
    mask = cls == t                                           # (C, TP) bool

    # Cross-entropy per pixel: log(sum exp(x-m)) - (x_target - m). No logp temp.
    xm_t = jnp.sum(jnp.where(mask, xm, 0.0), axis=0, keepdims=True)   # (1, TP)
    ce_pix = jnp.log(denom) - xm_t                                    # (1, TP)
    if ragged:
        # Pad columns would otherwise contribute log(C) each; cheap (1,TP) select.
        ce_pix = jnp.where(valid, ce_pix, 0.0)
    ce_ref[...] += jnp.sum(ce_pix, axis=1, keepdims=True)             # (1, 1)

    # Dice statistics per class.
    #   inter = sum(probs * onehot)   -> select instead of f32 one-hot multiply
    #   card  = sum(probs + onehot)   -> single fused lane reduction
    inter_ref[...] += jnp.sum(jnp.where(mask, probs, 0.0),
                              axis=1, keepdims=True)                  # (C, 1)
    card_ref[...] += jnp.sum(jnp.where(mask, probs + 1.0, probs),
                             axis=1, keepdims=True)                   # (C, 1)
    # NOTE: pad columns (ragged) add 1/C per class to card; corrected analytically
    # in the JAX epilogue instead of a per-tile (C,TP) mask multiply.


# ---------------------------------------------------------------------------
# Tiling helpers
# ---------------------------------------------------------------------------
def _vmem_capacity_bytes() -> int:
    """Physical per-core VMEM, queried at trace time; conservative fallback."""
    try:
        return int(pltpu.get_tpu_info().vmem_capacity_bytes)
    except Exception:
        return 64 * 1024 * 1024            # v7x per-core size: safe everywhere


def _vmem_tile_cap(num_classes: int, in_itemsize: int, vmem_cap: int) -> int:
    """Largest lane-tile width whose double-buffered inputs + f32 intermediates
    stay under ~3/8 of physical VMEM (48 MiB on 128 MiB chips, 24 MiB on v7x)."""
    budget = (vmem_cap * 3) // 8
    per_col = (2 * (num_classes * in_itemsize + 4)     # 2x-buffered logits + labels
               + 8 * num_classes * 4                   # live (C,) f32 temps
               + 16)                                   # (1,) row temps
    cap = budget // per_col
    return max(128, (cap // 128) * 128)


def _round_up(v: int, m: int) -> int:
    return ((v + m - 1) // m) * m


def _pick_tile(hw: int, max_tile: int) -> int:
    """Pick a lane-tile width that is always a multiple of 128. Prefer one that
    divides H*W exactly (no masking in the hot loop); otherwise the explicit
    ragged path sanitizes the padded tail."""
    max_tile = max(128, (max_tile // 128) * 128)
    if hw <= max_tile:
        return _round_up(hw, 128)
    for tile in range(max_tile, 127, -128):            # multiples of 128, descending
        if hw % tile == 0:
            return tile
    return max_tile


# ---------------------------------------------------------------------------
# Wrapper
# ---------------------------------------------------------------------------
def multiclass_ce_with_dice_loss(x_nchw, targets_nhw, *, smooth=0.0, eps=1e-7,
                                 max_tile_p=None, hw_splits=None,
                                 compute_dtype=None):
    """CE + soft-Dice loss for logits (N, C, H, W) and integer targets (N, H, W)."""
    n, c, h, w = x_nchw.shape
    hw = h * w

    if compute_dtype is not None and x_nchw.dtype != compute_dtype:
        # Optional: cast once here (fuses into the producer under jit). Halves the
        # dominant HBM stream on HBM-bound v5e/v6e; default keeps exact f32.
        x_nchw = x_nchw.astype(compute_dtype)

    # Free, contiguous reshapes: no transpose, no pad, no extra HBM traffic.
    x = x_nchw.reshape(n, c, hw)
    t = targets_nhw.reshape(n, 1, hw).astype(jnp.int32)

    vmem_cap = _vmem_capacity_bytes()
    if max_tile_p is None:
        max_tile_p = 32768 if vmem_cap >= 96 * 1024 * 1024 else 16384

    tile = _pick_tile(hw, min(max_tile_p,
                              _vmem_tile_cap(c, x.dtype.itemsize, vmem_cap)))
    num_tiles = pl.cdiv(hw, tile)
    pad_cols = num_tiles * tile - hw
    ragged = pad_cols > 0

    # Second "parallel" split over the HW tiles so v7x's 2nd TensorCore is used
    # for single-image (N==1) workloads. Only applied when it divides evenly
    # (avoids fully out-of-bounds blocks).
    if hw_splits is None:
        hw_splits = 2 if (n == 1 and num_tiles >= 2) else 1
    if hw_splits < 1 or num_tiles % hw_splits != 0:
        hw_splits = 1
    tiles_per_split = num_tiles // hw_splits

    kernel = functools.partial(_loss_kernel, hw=hw, num_classes=c, tile=tile,
                               tiles_per_split=tiles_per_split, ragged=ragged)

    cost = pl.CostEstimate(
        flops=int(16 * n * c * hw),
        transcendentals=int(n * c * hw),
        bytes_accessed=int(n * hw * (c * x.dtype.itemsize + 4)
                           + n * hw_splits * (2 * c + 1) * 4),
    )

    ce_sum, inter, card = pl.pallas_call(
        kernel,
        out_shape=(
            jax.ShapeDtypeStruct((n, hw_splits, 1, 1), jnp.float32),
            jax.ShapeDtypeStruct((n, hw_splits, c, 1), jnp.float32),
            jax.ShapeDtypeStruct((n, hw_splits, c, 1), jnp.float32),
        ),
        grid_spec=pltpu.PrefetchScalarGridSpec(
            num_scalar_prefetch=0,
            grid=(n, hw_splits, tiles_per_split),      # (parallel, parallel, reduce)
            in_specs=[
                pl.BlockSpec((None, c, tile),
                             lambda b, s, i: (b, 0, s * tiles_per_split + i)),
                pl.BlockSpec((None, 1, tile),
                             lambda b, s, i: (b, 0, s * tiles_per_split + i)),
            ],
            out_specs=[
                pl.BlockSpec((None, None, 1, 1), lambda b, s, i: (b, s, 0, 0)),
                pl.BlockSpec((None, None, c, 1), lambda b, s, i: (b, s, 0, 0)),
                pl.BlockSpec((None, None, c, 1), lambda b, s, i: (b, s, 0, 0)),
            ],
        ),
        compiler_params=pltpu.CompilerParams(
            dimension_semantics=("parallel", "parallel", "arbitrary"),
            vmem_limit_bytes=int(vmem_cap // 2),
        ),
        cost_estimate=cost,
    )(x, t)

    # Tiny final reduction across the per-(image, split) partials in JAX.
    total_pix = n * hw
    ce_loss = jnp.sum(ce_sum) / jnp.float32(total_pix)
    inter_c = jnp.sum(inter, axis=(0, 1))[:, 0]                 # (C,)
    card_c = jnp.sum(card, axis=(0, 1))[:, 0]                   # (C,)
    if ragged:
        # Pad columns (x sanitized to 0) have uniform probs = 1/C per class:
        # subtract their analytic cardinality contribution once here instead of a
        # per-tile (C,TP) mask multiply inside the kernel.
        card_c = card_c - jnp.float32(n * pad_cols) / jnp.float32(c)
    dice = (2.0 * inter_c + smooth) / (card_c + smooth + eps)
    return ce_loss + (1.0 - jnp.mean(dice))


class MultiClassCEWithDiceLoss:
    """JAX/Pallas port of the PyTorch module (forward pass only)."""

    def __init__(self, ignore_index=None, smooth: float = 0.0, eps: float = 1e-7):
        # TODO(synk): ignore_index masking not implemented (module default is None).
        assert ignore_index is None, "only ignore_index=None is supported"
        self.smooth = smooth
        self.eps = eps

    def __call__(self, outputs, targets):
        losses = {}
        for name, x in outputs.items():
            losses[name] = multiclass_ce_with_dice_loss(
                x, targets, smooth=self.smooth, eps=self.eps)
        return losses["out"]


# ---------------------------------------------------------------------------
# Pure-JAX reference + self-test
# ---------------------------------------------------------------------------
def _reference_loss(x_nchw, targets_nhw, smooth=0.0, eps=1e-7):
    n, c, h, w = x_nchw.shape
    logits = x_nchw.astype(jnp.float32)
    logp = jax.nn.log_softmax(logits, axis=1)
    probs = jnp.exp(logp)
    onehot = jax.nn.one_hot(targets_nhw, c, dtype=jnp.float32)          # N,H,W,C
    onehot = jnp.transpose(onehot, (0, 3, 1, 2))                        # N,C,H,W
    ce = -jnp.mean(jnp.sum(logp * onehot, axis=1))
    inter = jnp.sum(probs * onehot, axis=(0, 2, 3))
    card = jnp.sum(probs + onehot, axis=(0, 2, 3))
    dice = (2.0 * inter + smooth) / (card + smooth + eps)
    return ce + (1.0 - jnp.mean(dice))


if __name__ == "__main__":
    key = jax.random.PRNGKey(0)
    k_logits, k_labels = jax.random.split(key)

    # Primary shape from the module spec.
    N, C, H, W = 2, 4, 16, 16
    logits = jax.random.normal(k_logits, (N, C, H, W), dtype=jnp.float32)
    targets = jax.random.randint(k_labels, (N, H, W), 0, C, dtype=jnp.int32)

    loss_mod = MultiClassCEWithDiceLoss(ignore_index=None, smooth=0.0, eps=1e-7)
    loss = jax.block_until_ready(loss_mod({"out": logits}, targets))
    ref = jax.block_until_ready(_reference_loss(logits, targets))
    # Tolerance covers the approximate EUP reciprocal used for the dice
    # statistics (CE path is exact); observed error is ~1e-4 on the total loss.
    assert jnp.allclose(loss, ref, rtol=2e-3, atol=2e-3), (loss, ref)

    # Exercise the multi-tile, hw-split and ragged code paths at tiny shapes.
    def _check(n, c, h, w, **kw):
        kl, kt = jax.random.split(jax.random.fold_in(key, n * 1000 + c * 100 + h))
        xs = jax.random.normal(kl, (n, c, h, w), dtype=jnp.float32)
        ts = jax.random.randint(kt, (n, h, w), 0, c, dtype=jnp.int32)
        got = jax.block_until_ready(multiclass_ce_with_dice_loss(xs, ts, **kw))
        want = jax.block_until_ready(_reference_loss(xs, ts))
        assert jnp.allclose(got, want, rtol=2e-3, atol=2e-3), (n, c, h, w, got, want)

    _check(1, 5, 16, 16, max_tile_p=128)   # 2 tiles, hw_splits=2 (v7x dual-core path)
    _check(2, 4, 13, 13)                   # ragged: hw=169 padded to a 256 tile
    _check(1, 4, 13, 13, max_tile_p=128)   # ragged + hw-split combined

    print("KERNEL_OK")
</pallas_src>

<mosaic_0001>
module attributes {stable_mosaic.version = 11 : i64} {
  func.func @_loss_kernel(%arg0: i32, %arg1: i32, %arg2: i32, %arg3: memref<1x4x256xf32, #tpu.memory_space<vmem>>, %arg4: memref<1x1x256xi32, #tpu.memory_space<vmem>>, %arg5: memref<1x1x1x1xf32, #tpu.memory_space<vmem>>, %arg6: memref<1x1x4x1xf32, #tpu.memory_space<vmem>>, %arg7: memref<1x1x4x1xf32, #tpu.memory_space<vmem>>) attributes {dimension_semantics = [#tpu.dimension_semantics<parallel>, #tpu.dimension_semantics<parallel>, #tpu.dimension_semantics<arbitrary>], iteration_bounds = array<i64: 2, 1, 1>, scalar_prefetch = 0 : i64, scratch_operands = 0 : i64, tpu.core_type = #tpu.core_type<tc>, window_params = [{transform_indices = @transform_0, window_bounds = array<i64: 1, 4, 256>}, {transform_indices = @transform_1, window_bounds = array<i64: 1, 1, 256>}, {transform_indices = @transform_2, window_bounds = array<i64: 1, 1, 1, 1>}, {transform_indices = @transform_3, window_bounds = array<i64: 1, 1, 4, 1>}, {transform_indices = @transform_4, window_bounds = array<i64: 1, 1, 4, 1>}]} {
    %c0_i32 = arith.constant 0 : i32
    %0 = arith.cmpi eq, %arg2, %c0_i32 : i32
    %1 = arith.extui %0 : i1 to i32
    %c0_i32_0 = arith.constant 0 : i32
    %2 = arith.cmpi ne, %1, %c0_i32_0 : i32
    scf.if %2 {
      %cst_38 = arith.constant 0.000000e+00 : f32
      %55 = vector.broadcast %cst_38 : f32 to vector<1x1xf32>
      %c0_39 = arith.constant 0 : index
      %c0_40 = arith.constant 0 : index
      %c0_41 = arith.constant 0 : index
      %c0_42 = arith.constant 0 : index
      %56 = vector.load %arg5[%c0_39, %c0_40, %c0_41, %c0_42] : memref<1x1x1x1xf32, #tpu.memory_space<vmem>>, vector<1x1x1x1xf32>
      %57 = vector.shape_cast %56 : vector<1x1x1x1xf32> to vector<1x1xf32>
      %58 = vector.shape_cast %55 : vector<1x1xf32> to vector<1x1x1x1xf32>
      tpu.vector_store %arg5[%c0_39, %c0_40, %c0_41, %c0_42], %58 {strides = array<i32>} : memref<1x1x1x1xf32, #tpu.memory_space<vmem>>, vector<1x1x1x1xf32>,
      %cst_43 = arith.constant 0.000000e+00 : f32
      %59 = vector.broadcast %cst_43 : f32 to vector<4x1xf32>
      %c0_44 = arith.constant 0 : index
      %c0_45 = arith.constant 0 : index
      %c0_46 = arith.constant 0 : index
      %c0_47 = arith.constant 0 : index
      %60 = vector.load %arg6[%c0_44, %c0_45, %c0_46, %c0_47] : memref<1x1x4x1xf32, #tpu.memory_space<vmem>>, vector<1x1x4x1xf32>
      %61 = vector.shape_cast %60 : vector<1x1x4x1xf32> to vector<4x1xf32>
      %62 = vector.shape_cast %59 : vector<4x1xf32> to vector<1x1x4x1xf32>
      tpu.vector_store %arg6[%c0_44, %c0_45, %c0_46, %c0_47], %62 {strides = array<i32>} : memref<1x1x4x1xf32, #tpu.memory_space<vmem>>, vector<1x1x4x1xf32>,
      %cst_48 = arith.constant 0.000000e+00 : f32
      %63 = vector.broadcast %cst_48 : f32 to vector<4x1xf32>
      %c0_49 = arith.constant 0 : index
      %c0_50 = arith.constant 0 : index
      %c0_51 = arith.constant 0 : index
      %c0_52 = arith.constant 0 : index
      %64 = vector.load %arg7[%c0_49, %c0_50, %c0_51, %c0_52] : memref<1x1x4x1xf32, #tpu.memory_space<vmem>>, vector<1x1x4x1xf32>
      %65 = vector.shape_cast %64 : vector<1x1x4x1xf32> to vector<4x1xf32>
      %66 = vector.shape_cast %63 : vector<4x1xf32> to vector<1x1x4x1xf32>
      tpu.vector_store %arg7[%c0_49, %c0_50, %c0_51, %c0_52], %66 {strides = array<i32>} : memref<1x1x4x1xf32, #tpu.memory_space<vmem>>, vector<1x1x4x1xf32>,
    } else {
    }
    %c0 = arith.constant 0 : index
    %c0_1 = arith.constant 0 : index
    %c0_2 = arith.constant 0 : index
    %3 = vector.load %arg3[%c0, %c0_1, %c0_2] : memref<1x4x256xf32, #tpu.memory_space<vmem>>, vector<1x4x256xf32>
    %4 = vector.shape_cast %3 : vector<1x4x256xf32> to vector<4x256xf32>
    %c0_3 = arith.constant 0 : index
    %c0_4 = arith.constant 0 : index
    %c0_5 = arith.constant 0 : index
    %5 = vector.load %arg4[%c0_3, %c0_4, %c0_5] : memref<1x1x256xi32, #tpu.memory_space<vmem>>, vector<1x1x256xi32>
    %6 = vector.shape_cast %5 : vector<1x1x256xi32> to vector<1x256xi32>
    %cst = arith.constant dense<0xFF800000> : vector<256xf32>
    %7 = vector.multi_reduction <maximumf>, %4, %cst [0] : vector<4x256xf32> to vector<256xf32>
    %8 = vector.shape_cast %7 : vector<256xf32> to vector<1x256xf32>
    %9 = vector.broadcast %8 : vector<1x256xf32> to vector<4x256xf32>
    %10 = arith.subf %4, %9 : vector<4x256xf32>
    %11 = math.exp %10 : vector<4x256xf32>
    %cst_6 = arith.constant dense<0.000000e+00> : vector<256xf32>
    %12 = vector.multi_reduction <add>, %11, %cst_6 [0] : vector<4x256xf32> to vector<256xf32>
    %13 = vector.shape_cast %12 : vector<256xf32> to vector<1x256xf32>
    %14 = tpu.reciprocal %13 {approx = true} : vector<1x256xf32> -> vector<1x256xf32>
    %15 = vector.broadcast %14 : vector<1x256xf32> to vector<4x256xf32>
    %16 = arith.mulf %11, %15 : vector<4x256xf32>
    %17 = tpu.iota {dimensions = array<i32: 0>} : vector<4x256xi32>
    %18 = vector.broadcast %6 : vector<1x256xi32> to vector<4x256xi32>
    %19 = arith.cmpi eq, %17, %18 : vector<4x256xi32>
    %cst_7 = arith.constant 0.000000e+00 : f32
    %20 = vector.broadcast %cst_7 : f32 to vector<4x256xf32>
    %21 = arith.select %19, %10, %20 : vector<4x256xi1>, vector<4x256xf32>
    %cst_8 = arith.constant dense<0.000000e+00> : vector<256xf32>
    %22 = vector.multi_reduction <add>, %21, %cst_8 [0] : vector<4x256xf32> to vector<256xf32>
    %23 = vector.shape_cast %22 : vector<256xf32> to vector<1x256xf32>
    %24 = math.log %13 : vector<1x256xf32>
    %25 = arith.subf %24, %23 : vector<1x256xf32>
    %c0_9 = arith.constant 0 : index
    %c0_10 = arith.constant 0 : index
    %c0_11 = arith.constant 0 : index
    %c0_12 = arith.constant 0 : index
    %26 = vector.load %arg5[%c0_9, %c0_10, %c0_11, %c0_12] : memref<1x1x1x1xf32, #tpu.memory_space<vmem>>, vector<1x1x1x1xf32>
    %27 = vector.shape_cast %26 : vector<1x1x1x1xf32> to vector<1x1xf32>
    %cst_13 = arith.constant dense<0.000000e+00> : vector<1xf32>
    %28 = vector.multi_reduction <add>, %25, %cst_13 [1] : vector<1x256xf32> to vector<1xf32>
    %29 = vector.shape_cast %28 : vector<1xf32> to vector<1x1xf32>
    %30 = arith.addf %27, %29 : vector<1x1xf32>
    %c0_14 = arith.constant 0 : index
    %c0_15 = arith.constant 0 : index
    %c0_16 = arith.constant 0 : index
    %c0_17 = arith.constant 0 : index
    %31 = vector.load %arg5[%c0_14, %c0_15, %c0_16, %c0_17] : memref<1x1x1x1xf32, #tpu.memory_space<vmem>>, vector<1x1x1x1xf32>
    %32 = vector.shape_cast %31 : vector<1x1x1x1xf32> to vector<1x1xf32>
    %33 = vector.shape_cast %30 : vector<1x1xf32> to vector<1x1x1x1xf32>
    tpu.vector_store %arg5[%c0_14, %c0_15, %c0_16, %c0_17], %33 {strides = array<i32>} : memref<1x1x1x1xf32, #tpu.memory_space<vmem>>, vector<1x1x1x1xf32>,
    %c0_18 = arith.constant 0 : index
    %c0_19 = arith.constant 0 : index
    %c0_20 = arith.constant 0 : index
    %c0_21 = arith.constant 0 : index
    %34 = vector.load %arg6[%c0_18, %c0_19, %c0_20, %c0_21] : memref<1x1x4x1xf32, #tpu.memory_space<vmem>>, vector<1x1x4x1xf32>
    %35 = vector.shape_cast %34 : vector<1x1x4x1xf32> to vector<4x1xf32>
    %cst_22 = arith.constant 0.000000e+00 : f32
    %36 = vector.broadcast %cst_22 : f32 to vector<4x256xf32>
    %37 = arith.select %19, %16, %36 : vector<4x256xi1>, vector<4x256xf32>
    %cst_23 = arith.constant dense<0.000000e+00> : vector<4xf32>
    %38 = vector.multi_reduction <add>, %37, %cst_23 [1] : vector<4x256xf32> to vector<4xf32>
    %39 = vector.shape_cast %38 : vector<4xf32> to vector<4x1xf32>
    %40 = arith.addf %35, %39 : vector<4x1xf32>
    %c0_24 = arith.constant 0 : index
    %c0_25 = arith.constant 0 : index
    %c0_26 = arith.constant 0 : index
    %c0_27 = arith.constant 0 : index
    %41 = vector.load %arg6[%c0_24, %c0_25, %c0_26, %c0_27] : memref<1x1x4x1xf32, #tpu.memory_space<vmem>>, vector<1x1x4x1xf32>
    %42 = vector.shape_cast %41 : vector<1x1x4x1xf32> to vector<4x1xf32>
    %43 = vector.shape_cast %40 : vector<4x1xf32> to vector<1x1x4x1xf32>
    tpu.vector_store %arg6[%c0_24, %c0_25, %c0_26, %c0_27], %43 {strides = array<i32>} : memref<1x1x4x1xf32, #tpu.memory_space<vmem>>, vector<1x1x4x1xf32>,
    %c0_28 = arith.constant 0 : index
    %c0_29 = arith.constant 0 : index
    %c0_30 = arith.constant 0 : index
    %c0_31 = arith.constant 0 : index
    %44 = vector.load %arg7[%c0_28, %c0_29, %c0_30, %c0_31] : memref<1x1x4x1xf32, #tpu.memory_space<vmem>>, vector<1x1x4x1xf32>
    %45 = vector.shape_cast %44 : vector<1x1x4x1xf32> to vector<4x1xf32>
    %cst_32 = arith.constant 1.000000e+00 : f32
    %46 = vector.broadcast %cst_32 : f32 to vector<4x256xf32>
    %47 = arith.addf %16, %46 : vector<4x256xf32>
    %48 = arith.select %19, %47, %16 : vector<4x256xi1>, vector<4x256xf32>
    %cst_33 = arith.constant dense<0.000000e+00> : vector<4xf32>
    %49 = vector.multi_reduction <add>, %48, %cst_33 [1] : vector<4x256xf32> to vector<4xf32>
    %50 = vector.shape_cast %49 : vector<4xf32> to vector<4x1xf32>
    %51 = arith.addf %45, %50 : vector<4x1xf32>
    %c0_34 = arith.constant 0 : index
    %c0_35 = arith.constant 0 : index
    %c0_36 = arith.constant 0 : index
    %c0_37 = arith.constant 0 : index
    %52 = vector.load %arg7[%c0_34, %c0_35, %c0_36, %c0_37] : memref<1x1x4x1xf32, #tpu.memory_space<vmem>>, vector<1x1x4x1xf32>
    %53 = vector.shape_cast %52 : vector<1x1x4x1xf32> to vector<4x1xf32>
    %54 = vector.shape_cast %51 : vector<4x1xf32> to vector<1x1x4x1xf32>
    tpu.vector_store %arg7[%c0_34, %c0_35, %c0_36, %c0_37], %54 {strides = array<i32>} : memref<1x1x4x1xf32, #tpu.memory_space<vmem>>, vector<1x1x4x1xf32>,
    return
  }
  func.func @transform_0(%arg0: i32, %arg1: i32, %arg2: i32) -> (i32, i32, i32) {
    %c1_i32 = arith.constant 1 : i32
    %0 = arith.muli %arg1, %c1_i32 : i32
    %1 = arith.addi %0, %arg2 : i32
    %c0_i32 = arith.constant 0 : i32
    %c0_i32_0 = arith.constant 0 : i32
    return %arg0, %c0_i32, %1 : i32, i32, i32
  }
  func.func @transform_1(%arg0: i32, %arg1: i32, %arg2: i32) -> (i32, i32, i32) {
    %c1_i32 = arith.constant 1 : i32
    %0 = arith.muli %arg1, %c1_i32 : i32
    %1 = arith.addi %0, %arg2 : i32
    %c0_i32 = arith.constant 0 : i32
    %c0_i32_0 = arith.constant 0 : i32
    return %arg0, %c0_i32, %1 : i32, i32, i32
  }
  func.func @transform_2(%arg0: i32, %arg1: i32, %arg2: i32) -> (i32, i32, i32, i32) {
    %c0_i32 = arith.constant 0 : i32
    %c0_i32_0 = arith.constant 0 : i32
    %c0_i32_1 = arith.constant 0 : i32
    return %arg0, %arg1, %c0_i32, %c0_i32_0 : i32, i32, i32, i32
  }
  func.func @transform_3(%arg0: i32, %arg1: i32, %arg2: i32) -> (i32, i32, i32, i32) {
    %c0_i32 = arith.constant 0 : i32
    %c0_i32_0 = arith.constant 0 : i32
    %c0_i32_1 = arith.constant 0 : i32
    return %arg0, %arg1, %c0_i32, %c0_i32_0 : i32, i32, i32, i32
  }
  func.func @transform_4(%arg0: i32, %arg1: i32, %arg2: i32) -> (i32, i32, i32, i32) {
    %c0_i32 = arith.constant 0 : i32
    %c0_i32_0 = arith.constant 0 : i32
    %c0_i32_1 = arith.constant 0 : i32
    return %arg0, %arg1, %c0_i32, %c0_i32_0 : i32, i32, i32, i32
  }
}

</mosaic_0001>

<bundles_post_ra>
// kernel: tpu_custom_call.1
= control target key start
LH: loop header
LB: loop body
LE: loop exit
PB: predicated region body
PF: predicated region fallthrough
CT: control target
= control target key end

     0   :  { %10 = vsyncpa [#allocation3], 0  ;;  %s1062_s0 = inlined_call_operand.hbm [shape: f32[2,4,256], index: 0, kind: input, shape index: {}]   ;;  %s1063_s1 = inlined_call_operand.hbm [shape: s32[2,1,256], index: 1, kind: input, shape index: {}]   ;;  %s1064_s2 = inlined_call_operand.vmem [shape: f32[2,1,1,1], index: 2, kind: output, shape index: {0}]   ;;  %s1065_s3 = inlined_call_operand.vmem [shape: f32[2,1,4,1], index: 3, kind: output, shape index: {1}]   ;;  %s1066_s4 = inlined_call_operand.vmem [shape: f32[2,1,4,1], index: 4, kind: output, shape index: {2}]  }
   0x1   :  { %12 = vsyncpa [#allocation3 + $0x1], 0 }
   0x2   :  { %13 = vsyncpa [#allocation5], 0 }
   0x3   :  { %15 = vsyncpa [#allocation5 + $0x1], 0  ;;  %s905_s15 = smov 0   ;;  %s907_s16 = smov 0  }
   0x4   :  { %s909_s17 = smov 0   ;;  %s911_s18 = smov 0  }
   0x5   :  { %s913_s19 = smov 0   ;;  %s915_s20 = smov 0  }
   0x6 LB: > { %s675_s21 = sadd.s32 4294967295, %s877_s20   ;;  %s40_s22 = sadd.s32 1, %s873_s19  ;;  %s877_s20 = sphi %s915_s20, %s21_s20   ;;  %s873_s19 = sphi %s913_s19, %s1078_s19   ;;  %s869_s18 = sphi %s911_s18, %s1077_s18   ;;  %s865_s17 = sphi %s909_s17, %s1076_s17   ;;  %s861_s16 = sphi %s907_s16, %s1075_s16   ;;  %s857_s15 = sphi %s905_s15, %s1074_s15  }
   0x7   : > { %p42_p0 = scmp.ge.s32.totalorder %s40_s22, 2  ;;  %s51_s23 = sadd.s32 1, %s865_s17 }
   0x8   : > { %p58_p1 = scmp.ne.s32.totalorder %s865_s17, %s861_s16  ;;  %p59_p2 = scmp.eq.s32.totalorder %s877_s20, 0 }
   0x9   : > { %s1080_s22 = smov (%p42_p0, %s40_s22), 0  ;;  %p64_p4 = scmp.ne.s32.totalorder %s861_s16, %s857_s15 }
   0xa   : > { %p941_p3 = por %p59_p2, %p58_p1  ;;  %s46_s25 = ssub.s32 %s873_s19, %s1080_s22 }
   0xb   : > { %p65_p5 = scmp.eq.s32.totalorder %s675_s21, 0  ;;  %p49_p6 = scmp.eq.s32.totalorder %s46_s25, 0 }
   0xc   : > { %p703_p8 = scmp.lt.s32.totalorder %s877_s20, 2  ;;  %s202_s28 = sand.u32 1, %s865_s17  }
   0xd   : > { %p948_p7 = por %p65_p5, %p64_p4  ;;  %s691_s29 = sshll.u32 %s873_s19, 3 }
   0xe   : > { %s954_s27 = scalar_select %p49_p6, %s865_s17, %s51_s23  }
   0xf   : > { %s679_s30 = sshll.u32 %s202_s28, 3  ;;  %s214_s7 = scalar_lea.hbm %s1062_s0, %s691_s29 }
  0x10   : > { %s216_s8 = sshll.u32 %s214_s7, 4  ;;  %s206_s9 = scalar_lea.vmem [#allocation2], %s679_s30  ;;  %s217_s8 = int_to_ptr.hbm [resolvable:$true] %s216_s8 }
  0x11   : > { %s218_s10 = sshll.u32 %s206_s9, 4  ;;  %p963_p9 = pnand %p703_p8, %p941_p3  ;;  %s219_s10 = int_to_ptr.vmem [resolvable:$true] %s218_s10 }
  0x12   : > { %p684_p10 = scmp.ge.s32.totalorder %s877_s20, 1  ;;  %p245_p11 = scmp.lt.s32.totalorder %s877_s20, 3 }
  0x13   : > { %s682_s12 = sshll.u32 %s202_s28, 1  ;;  %s203_s13 = scalar_lea.sflag [#allocation3], %s202_s28 }
  0x14   : > { %699 = dma.hbm_to_vmem [thread:$0]  (!%p963_p9), %s217_s8, 128, %s219_s10, %s203_s13  }
  0x15   : > { %p246_p12 = pnand %p684_p10, %p245_p11  ;;  %s683_s14 = sshll.u32 %s873_s19, 1 }
  0x16   : > { %s229_s15 = scalar_lea.vmem [#allocation4], %s682_s12  ;;  %s236_s24 = scalar_lea.hbm %s1063_s1, %s683_s14 }
  0x17   : > { %s240_s21 = sshll.u32 %s229_s15, 4  ;;  %s238_s29 = sshll.u32 %s236_s24, 4  ;;  %s241_s21 = int_to_ptr.vmem [resolvable:$true] %s240_s21  ;;  %s239_s29 = int_to_ptr.hbm [resolvable:$true] %s238_s29 }
  0x18   : > { %s226_s30 = scalar_lea.sflag [#allocation5], %s202_s28  ;;  %249 = sbr.rel (%p246_p12) target bundleno = 250 (0xfa), region = 28 }
  0x19   : > { %702 = dma.hbm_to_vmem [thread:$0]  (!%p963_p9), %s239_s29, 32, %s241_s21, %s226_s30  }
  0x1a   : > { %s251_s5 = sand.u32 (!%p246_p12), 1, %s861_s16  }
  0x1b   : > { %s685_s6 = sshll.u32 (!%p246_p12), %s251_s5, 3  ;;  %s252_s7 = scalar_lea.sflag (!%p246_p12), [#allocation3], %s251_s5 }
  0x1c   : > { %s255_s8 = scalar_lea.vmem (!%p246_p12), [#allocation2], %s685_s6 }
  0x1d   : > { %848 = dma.done.wait (%p948_p7), %s252_s7, 128  }
  0x1e   : > { %850 = vsyncadd (%p948_p7), %s252_s7, 4294967168  ;;  %s686_s9 = sshll.u32 %s251_s5, 1  ;;  %s262_s10 = scalar_lea.sflag [#allocation5], %s251_s5 }
  0x1f   : > { %s265_s12 = scalar_lea.vmem [#allocation4], %s686_s9 }
  0x20   : > { %852 = dma.done.wait (%p948_p7), %s262_s10, 32  }
  0x21   : > { %854 = vsyncadd (%p948_p7), %s262_s10, 4294967264  ;;  %v344_v0 = vld [vmem:[%s255_s8] sm:$0xff]  ;;  %vm352_vm0 = vcmask 1043456   ;;  %v345_v22 = vld [vmem:[%s265_s12] sm:$0x3]  ;;  %v403_v23 = vlaneseq  ;;  %p315_p13 = scmp.lt.s32.totalorder %s869_s18, 1 }
  0x22   : > { %347 = vst [vmem:[#allocation1] ss:$2 sm:$0xff] %v344_v0  ;;  %v405_v28 = vperm.slane %v345_v22, 0  ;;  %v406_v32 = vperm.slane %v345_v22, 1  ;;  %vm339_vm3 = vcmask 0   ;;  %vm341_vm4 = vcmask 3072  }
  0x23   : > { %v404_v31 = vshrl.u32 %v403_v23, 7  ;;  %s1082_s18 = smov (!%p315_p13, %s869_s18), 1 }
  0x24   : > { %s1016_s11 = scalar_lea.vmem %s1064_s2, %s1082_s18  ;;  %s687_s13 = sshll.u32 %s1082_s18, 2 }
  0x25   : > { %vm994_vm1 = vcmp.eq.s32.totalorder %v404_v31, %v405_v28  ;;  %vm998_vm2 = vcmp.eq.s32.totalorder %v404_v31, %v406_v32  ;;  %s334_s21 = scalar_lea.vmem %s1066_s4, %s687_s13  ;;  %s327_s24 = scalar_lea.vmem %s1065_s3, %s687_s13 }
  0x29   : > { %v348_v1 = vld.sshfl [vmem:[#allocation1] sm:$0xff pattern:$0x75316420]  ;;  %v349_v2 = vld.sshfl [vmem:[#allocation1 + $0x8] sm:$0xff pattern:$0x75316420] }
  0x2a   : > { %v353_v3 = vsel %vm352_vm0, %v348_v1, -inf  ;;  %v360_v4 = vsel %vm352_vm0, %v349_v2, -inf }
  0x2b   : > { %v354_v5 = vrot.slane %v353_v3, 4  ;;  %v361_v6 = vrot.slane %v360_v4, 4 }
  0x2d   : > { %v355_v7 = vmax.f32 %v353_v3, %v354_v5  ;;  %v362_v8 = vmax.f32 %v360_v4, %v361_v6 }
  0x2f   : > { %v356_v9 = vrot.slane %v355_v7, 2  ;;  %v363_v10 = vrot.slane %v362_v8, 2 }
  0x31   : > { %v357_v11 = vmax.f32 %v355_v7, %v356_v9  ;;  %v364_v12 = vmax.f32 %v362_v8, %v363_v10  ;;  %v879_v8 = vmov 0.0  }
  0x32   : > { %340 = vst.msk [vmem:[%s1016_s11] sm:$0x1] %vm339_vm3, %v879_v8 }
  0x33   : > { %v358_v13 = vrot.slane %v357_v11, 1  ;;  %v365_v14 = vrot.slane %v364_v12, 1  ;;  %343 = vst.msk [vmem:[%s334_s21] sm:$0xf] %vm341_vm4, %v879_v8 }
  0x34   : > { %342 = vst.msk [vmem:[%s327_s24] sm:$0xf] %vm341_vm4, %v879_v8 }
  0x35   : > { %v359_v15 = vmax.f32 %v357_v11, %v358_v13  ;;  %v366_v16 = vmax.f32 %v364_v12, %v365_v14 }
  0x37   : > { %v369_v17 = vrot.slane %v366_v16, 4 }
  0x39   : > { %v370_v18 = vsel %vm352_vm0, %v359_v15, %v369_v17 }
  0x3a   : > { %v372_v19 = vsub.f32 %v344_v0, %v370_v18 }
  0x3b   : > { %v444_v32 = vld [vmem:[%s327_s24] sm:$0xf] }
  0x3c   : > { %v373_v20 = vmul.f32 1.442695, %v372_v19 }
  0x3e   : > { %753 = vpow2.f32 %v373_v20 }
  0x44   : > { %v989_v21 = vpop.eup %753 }
  0x45   : > { %376 = vst [vmem:[#allocation1] ss:$2 sm:$0xff] %v989_v21 }
  0x4c   : > { %v377_v24 = vld.sshfl [vmem:[#allocation1] sm:$0xff pattern:$0x75316420]  ;;  %v378_v25 = vld.sshfl [vmem:[#allocation1 + $0x8] sm:$0xff pattern:$0x75316420] }
  0x4d   : > { %v381_v26 = vsel %vm352_vm0, %v377_v24, 0.0  ;;  %v388_v27 = vsel %vm352_vm0, %v378_v25, 0.0  ;;  %410 = vst [vmem:[#allocation1] ss:$2 sm:$0xff] %v372_v19 }
  0x4e   : > { %v382_v29 = vrot.slane %v381_v26, 4  ;;  %v389_v30 = vrot.slane %v388_v27, 4 }
  0x50   : > { %v383_v33 = vadd.f32 %v382_v29, %v381_v26  ;;  %v390_v34 = vadd.f32 %v389_v30, %v388_v27  ;;  %v437_v29 = vld [vmem:[%s1016_s11] sm:$0x1] }
  0x52   : > { %v384_v35 = vrot.slane %v383_v33, 2  ;;  %v391_v36 = vrot.slane %v390_v34, 2 }
  0x54   : > { %v385_v39 = vadd.f32 %v384_v35, %v383_v33  ;;  %v392_v40 = vadd.f32 %v391_v36, %v390_v34  ;;  %v411_v41 = vld.sshfl [vmem:[#allocation1] sm:$0xff pattern:$0x75316420]  ;;  %v412_v42 = vld.sshfl [vmem:[#allocation1 + $0x8] sm:$0xff pattern:$0x75316420] }
  0x55   : > { %v415_v43 = vsel %vm994_vm1, %v411_v41, 0.0  ;;  %v416_v44 = vsel %vm998_vm2, %v412_v42, 0.0  ;;  %v461_v35 = vld [vmem:[%s334_s21] sm:$0xf] }
  0x56   : > { %v386_v45 = vrot.slane %v385_v39, 1  ;;  %v393_v46 = vrot.slane %v392_v40, 1  ;;  %v417_v47 = vsel %vm352_vm0, %v415_v43, 0.0  ;;  %v424_v48 = vsel %vm352_vm0, %v416_v44, 0.0 }
  0x57   : > { %v418_v49 = vrot.slane %v417_v47, 4  ;;  %v425_v50 = vrot.slane %v424_v48, 4 }
  0x58   : > { %v394_v51 = vadd.f32 %v393_v46, %v392_v40  ;;  %v387_v52 = vadd.f32 %v386_v45, %v385_v39 }
  0x59   : > { %v419_v53 = vadd.f32 %v418_v49, %v417_v47  ;;  %v426_v54 = vadd.f32 %v425_v50, %v424_v48 }
  0x5a   : > { %755 = vrcp.f32 %v394_v51 }
  0x5b   : > { %v420_v55 = vrot.slane %v419_v53, 2  ;;  %v427_v56 = vrot.slane %v426_v54, 2  ;;  %757 = vlog2.f32 %v387_v52 }
  0x5c   : > { %759 = vlog2.f32 %v394_v51 }
  0x5d   : > { %v421_v57 = vadd.f32 %v420_v55, %v419_v53  ;;  %v428_v58 = vadd.f32 %v427_v56, %v426_v54  ;;  %761 = vrcp.f32 %v387_v52 }
  0x5f   : > { %v422_v59 = vrot.slane %v421_v57, 1  ;;  %v429_v60 = vrot.slane %v428_v58, 1 }
  0x60   : > { %v756_v61 = vpop.eup %755 }
  0x61   : > { %v758_v62 = vpop.eup %757  ;;  %v399_v63 = vrot.slane %v756_v61, 4  ;;  %v423_v0 = vadd.f32 %v422_v59, %v421_v57  ;;  %v430_v1 = vadd.f32 %v429_v60, %v428_v58 }
  0x62   : > { %v760_v2 = vpop.eup %759  ;;  %v432_v3 = vmul.f32 0.6931472, %v758_v62 }
  0x63   : > { %v762_v4 = vpop.eup %761  ;;  %v434_v5 = vmul.f32 0.6931472, %v760_v2 }
  0x64   : > { %v435_v6 = vsub.f32 %v432_v3, %v423_v0  ;;  %v400_v7 = vsel %vm352_vm0, %v762_v4, %v399_v63 }
  0x65   : > { %v436_v9 = vsub.f32 %v434_v5, %v430_v1  ;;  %v402_v10 = vmul.f32 %v989_v21, %v400_v7 }
  0x67   : > { %v438_v11 = vadd.f32 %v436_v9, %v435_v6  ;;  %446 = vst [vmem:[#allocation1] ss:$2 sm:$0xff] %v402_v10  ;;  %v462_v12 = vadd.f32 1.0, %v402_v10 }
  0x69   : > { %439 = vadd.xlane.f32.xlu0 %v438_v11 }
  0x6e   : > { %v447_v13 = vld.sshfl [vmem:[#allocation1] sm:$0xff pattern:$0x75316420]  ;;  %v448_v14 = vld.sshfl [vmem:[#allocation1 + $0x8] sm:$0xff pattern:$0x75316420] }
  0x6f   : > { %464 = vst [vmem:[#allocation1] ss:$2 sm:$0xff] %v462_v12  ;;  %v451_v15 = vsel %vm994_vm1, %v447_v13, 0.0  ;;  %v452_v16 = vsel %vm998_vm2, %v448_v14, 0.0 }
  0x70   : > { %v453_v17 = vsel %vm352_vm0, %v451_v15, 0.0  ;;  %v454_v18 = vsel %vm352_vm0, %v452_v16, 0.0 }
  0x71   : > { %v455_v19 = vadd.f32 %v454_v18, %v453_v17 }
  0x73   : > { %456 = vadd.xlane.f32.xlu0 %v455_v19 }
  0x76   : > { %v465_v20 = vld.sshfl [vmem:[#allocation1] sm:$0xff pattern:$0x75316420]  ;;  %v466_v21 = vld.sshfl [vmem:[#allocation1 + $0x8] sm:$0xff pattern:$0x75316420] }
  0x77   : > { %469 = vst [vmem:[#allocation1] ss:$2 sm:$0xff] %v402_v10 }
  0x7e   : > { %v470_v22 = vld.sshfl [vmem:[#allocation1] sm:$0xff pattern:$0x75316420]  ;;  %v471_v23 = vld.sshfl [vmem:[#allocation1 + $0x8] sm:$0xff pattern:$0x75316420] }
  0x7f   : > { %v474_v24 = vsel %vm994_vm1, %v465_v20, %v470_v22  ;;  %v475_v25 = vsel %vm998_vm2, %v466_v21, %v471_v23 }
  0x80   : > { %v476_v26 = vsel %vm352_vm0, %v474_v24, 0.0  ;;  %v477_v27 = vsel %vm352_vm0, %v475_v25, 0.0 }
  0x81   : > { %v478_v28 = vadd.f32 %v477_v27, %v476_v26 }
  0x83   : > { %479 = vadd.xlane.f32.xlu1 %v478_v28 }
  0xdc   : > { %v440_v30 = vpop.xlane.xlu0 %439 }
  0xdd   : > { %v441_v31 = vadd.f32 %v440_v30, %v437_v29 }
  0xdf   : > { %443 = vst.msk [vmem:[%s1016_s11] sm:$0x1] %vm339_vm3, %v441_v31 }
  0xe6   : > { %v457_v33 = vpop.xlane.xlu0 %456 }
  0xe7   : > { %v458_v34 = vadd.f32 %v457_v33, %v444_v32 }
  0xe9   : > { %460 = vst.msk [vmem:[%s327_s24] sm:$0xf] %vm341_vm4, %v458_v34 }
  0xf6   : > { %v480_v36 = vpop.xlane.xlu1 %479 }
  0xf7   : > { %v481_v37 = vadd.f32 %v480_v36, %v461_v35 }
  0xf9   : > { %482 = vst.msk [vmem:[%s334_s21] sm:$0xf] %vm341_vm4, %v481_v37 }
  0xfa PF: > { %s21_s20 = sadd.s32 1, %s877_s20   ;;  %s1074_s15 = smov %s861_s16 }
  0xfb   : > { %p18_p0 = scmp.ge.s32.totalorder %s21_s20, 4   ;;  %s1075_s16 = smov %s865_s17 }
  0xfc   : > { %s1076_s17 = smov %s954_s27  ;;  %s1077_s18 = smov %s873_s19 }
  0xfd   : > { %s1078_s19 = smov %s1080_s22  ;;  %20 = sbr.rel (!%p18_p0) target bundleno = 6 (0x6), region = 109 }
 0x102   :  { %546 = vsyncpa [#allocation3], 1 }
 0x103   :  { %548 = vsyncpa [#allocation3 + $0x1], 1 }
 0x104   :  { %549 = vsyncpa [#allocation5], 1 }
 0x105   :  { %551 = vsyncpa [#allocation5 + $0x1], 1 }

</bundles_post_ra>
